<compile_context>
chip_gen: v7x
topology: tpu7x:2x2x1
jax: 0.10.0
libtpu: 0.0.40
codegen_flags: <defaults>
</compile_context>

<pallas_src>
import functools

import jax
import jax.numpy as jnp
import numpy as np
from jax import lax
from jax.experimental import pallas as pl
from jax.experimental.pallas import tpu as pltpu


_TAPS = ((-1, -1), (-1, 0), (-1, 1),
         (0, -1),  (0, 0),  (0, 1),
         (1, -1),  (1, 0),  (1, 1))

_INTERP_FUSE_LIMIT_BYTES = 8 << 20   # max dense Kronecker interp-matrix size to fuse in-kernel


# ---------------------------------------------------------------------------
# Fused kernel:  [upsample(last)+add] -> DW3x3 -> BN -> PW1x1 -> BN -> ReLU
# Layout: NCHW with H*W flattened onto the TPU lane axis.
# ---------------------------------------------------------------------------
def _dwsep_kernel(*refs, H, W, Cin, Cout, NB, PADL, MODE, LANE_OUT):
    # refs (in order):
    #   x_ref      (NB, Cin, HW)     input images, lane-dense over HW
    #   [res_ref   (NB, Cin, HW)     when MODE == "add"   : pre-upsampled residual]
    #   [last_ref  (NB, Cin, HsWs)   when MODE == "interp": previous-level output]
    #   [m_ref     (HsWs, HW)        when MODE == "interp": Kronecker interp matrix]
    #   wdw_ref    (Cin, 9)          raw depthwise 3x3 taps (per channel)
    #   wpw_ref    (Cout, Cin)       pointwise weight with BOTH BatchNorms folded in
    #   bias_ref   (Cout, 1)         folded bias
    #   o_ref      (Cout, NB*HW) if LANE_OUT else (NB, Cout, HW)
    #   pad_ref    (Cin, HW+2*PADL)  scratch: zero-haloed flat line for the dw taps
    #   acc_ref    (Cin, NB*HW)      scratch: batched depthwise result for one MXU matmul
    refs = list(refs)
    x_ref = refs.pop(0)
    res_ref = last_ref = m_ref = None
    if MODE == "add":
        res_ref = refs.pop(0)
    elif MODE == "interp":
        last_ref = refs.pop(0)
        m_ref = refs.pop(0)
    wdw_ref, wpw_ref, bias_ref, o_ref, pad_ref, acc_ref = refs

    HW = H * W

    # Zero ONLY the two halo slabs (the middle is fully overwritten per image below).
    pad_ref[:, :PADL] = jnp.zeros((Cin, PADL), jnp.float32)
    pad_ref[:, PADL + HW:] = jnp.zeros((Cin, PADL), jnp.float32)

    # Hoist parameter loads out of the unrolled batch loop (JAX does not CSE repeated loads).
    wdw = wdw_ref[...]            # (Cin, 9)
    wpw = wpw_ref[...]            # (Cout, Cin)
    bias = bias_ref[...]          # (Cout, 1)
    m = m_ref[...] if MODE == "interp" else None

    # Column index of every flattened pixel; masks the tap column-offsets that would wrap
    # across image rows (row over/underflow is handled by the zero halo).
    col = lax.broadcasted_iota(jnp.int32, (Cin, HW), 1) % W
    left_ok = col >= 1            # column offset -1 valid
    right_ok = col < (W - 1)      # column offset +1 valid

    for b in range(NB):
        x_img = x_ref[b]
        if MODE == "add":
            x_img = x_img + res_ref[b]
        elif MODE == "interp":
            # Fused bilinear(align_corners=True) upsample of the previous level: one
            # (Cin,HsWs)@(HsWs,HW) MXU matmul, then the residual add.
            x_img = x_img + jnp.dot(last_ref[b], m, preferred_element_type=jnp.float32)

        # Stage this image into the middle of the zero-haloed line (PADL is 128-aligned).
        pad_ref[:, PADL:PADL + HW] = x_img

        # Depthwise 3x3: 9 statically shifted lane-slices, grouped by column offset so the
        # wrap masks are applied once per group (2 selects) instead of per tap (6 selects).
        acc_l = jnp.zeros((Cin, HW), jnp.float32)
        acc_c = jnp.zeros((Cin, HW), jnp.float32)
        acc_r = jnp.zeros((Cin, HW), jnp.float32)
        for t, (dh, dw) in enumerate(_TAPS):
            start = PADL + dh * W + dw
            contrib = pad_ref[:, start:start + HW] * wdw[:, t:t + 1]
            if dw == -1:
                acc_l = acc_l + contrib
            elif dw == 0:
                acc_c = acc_c + contrib
            else:
                acc_r = acc_r + contrib
        dw_out = (jnp.where(left_ok, acc_l, 0.0) + acc_c
                  + jnp.where(right_ok, acc_r, 0.0))
        acc_ref[:, b * HW:(b + 1) * HW] = dw_out

    # Pointwise 1x1 conv (+ both folded BNs) batched over all NB images:
    # ONE (Cout,Cin)@(Cin,NB*HW) MXU matmul + bias + ReLU.
    out = jnp.maximum(
        jnp.dot(wpw, acc_ref[...], preferred_element_type=jnp.float32) + bias, 0.0)

    if LANE_OUT:
        o_ref[...] = out.astype(o_ref.dtype)                 # single lane-dense store
    else:
        for b in range(NB):
            o_ref[b] = out[:, b * HW:(b + 1) * HW].astype(o_ref.dtype)


# ---------------------------------------------------------------------------
# Interpolation matrices (align_corners=True bilinear).
# ---------------------------------------------------------------------------
def _interp_matrix(dst, src):
    m = np.zeros((dst, src), np.float32)
    if dst == 1 or src == 1:
        m[:, 0] = 1.0
        return m
    pos = np.arange(dst, dtype=np.float64) * (src - 1) / (dst - 1)
    lo = np.clip(np.floor(pos).astype(np.int64), 0, src - 1)
    hi = np.minimum(lo + 1, src - 1)
    frac = (pos - lo).astype(np.float32)
    m[np.arange(dst), lo] += 1.0 - frac
    m[np.arange(dst), hi] += frac
    return m


def _kron_interp_matrix(Ht, Wt, Hs, Ws):
    """Dense (Hs*Ws, Ht*Wt) matrix so that up_flat = last_flat @ M is the bilinear upsample."""
    lh = _interp_matrix(Ht, Hs)
    lw = _interp_matrix(Wt, Ws)
    return jnp.asarray(np.kron(lh, lw).T.astype(np.float32))


def bilinear_upsample_align_corners(x, size):
    """Plain-JAX fallback (only used when the dense interp matrix is too big to fuse)."""
    N, C, Hs, Ws = x.shape
    Ht, Wt = size
    if (Hs, Ws) == (Ht, Wt):
        return x
    lh = jnp.asarray(_interp_matrix(Ht, Hs))
    lw = jnp.asarray(_interp_matrix(Wt, Ws))
    return jnp.einsum("th,nchw,uw->nctu", lh, x, lw)


# ---------------------------------------------------------------------------
# Batch-block selection.
# ---------------------------------------------------------------------------
def _pick_batch_block(N, HW, per_img_bytes, budget_bytes=12 << 20, max_nb=4):
    """Return (nb, lane_out).

    For levels whose flattened spatial size is already a multiple of 128 lanes, keep >= 2 grid
    steps when N >= 2 (dual-TC v7x megacore); for sub-128 levels lane-density of the output
    store wins, so fold the whole batch onto the lane axis when it fits the VMEM budget.
    TODO(synk): on single-TC v5e/v6e the >=2-step rule only adds per-step overhead; relaxing
    it needs a chip-generation query.
    """
    if HW % 128 != 0 and N <= 8 and N * per_img_bytes <= budget_bytes:
        return N, True
    nb = 1
    for cand in range(1, min(N, max_nb) + 1):
        if N % cand:
            continue
        if cand * per_img_bytes > budget_bytes:
            break
        if N >= 2 and N // cand < 2:
            break
        nb = cand
    return nb, False


# ---------------------------------------------------------------------------
# Wrapper: one pyramid level (fused upsample+add + DWSepConvModule).
# ---------------------------------------------------------------------------
def dwsep_conv_bn_relu(x, dw_w, bn1, pw_w, bn2, last=None, eps=1e-5):
    """x: (N, Cin, H, W) f32.  dw_w: (Cin, 1, 3, 3).  pw_w: (Cout, Cin, 1, 1).
    bn1 / bn2: (gamma, beta, running_mean, running_var) for the dw / pw BatchNorms (eval mode).
    last: previous lower-resolution level output (N, Cin, Hs, Ws) or None; when given, the
    bilinear(align_corners=True) upsample + residual add is fused into the kernel."""
    N, Cin, H, W = x.shape
    Cout = pw_w.shape[0]
    HW = H * W

    # One-time fold of both eval-mode BatchNorms into the pointwise weight/bias.
    g1, b1, m1, v1 = bn1
    g2, b2, m2, v2 = bn2
    s1 = g1 / jnp.sqrt(v1 + eps)
    o1 = b1 - m1 * s1
    s2 = g2 / jnp.sqrt(v2 + eps)
    o2 = b2 - m2 * s2
    pw = pw_w.reshape(Cout, Cin)
    w_eff = (s2[:, None] * pw * s1[None, :]).astype(jnp.float32)          # (Cout, Cin)
    b_eff = (s2 * (pw @ o1) + o2).reshape(Cout, 1).astype(jnp.float32)    # (Cout, 1)
    wdw = dw_w.reshape(Cin, 9).astype(jnp.float32)                        # raw dw taps

    x_flat = x.astype(jnp.float32).reshape(N, Cin, HW)   # NCHW consumed directly, no transpose

    # Residual / fused-upsample inputs.
    mode = "none"
    extra_in = []
    hsws = 0
    if last is not None:
        _, cl, Hs, Ws = last.shape
        assert cl == Cin
        if (Hs, Ws) == (H, W):
            mode = "add"
            extra_in = [last.astype(jnp.float32).reshape(N, Cin, HW)]
        elif Hs * Ws * HW * 4 <= _INTERP_FUSE_LIMIT_BYTES:
            mode = "interp"
            hsws = Hs * Ws
            extra_in = [last.astype(jnp.float32).reshape(N, Cin, hsws),
                        _kron_interp_matrix(H, W, Hs, Ws)]
        else:
            # TODO(synk): dense interp matrix too large to fuse; upsample in plain JAX and
            # fuse only the residual add.
            mode = "add"
            up = bilinear_upsample_align_corners(last, (H, W))
            extra_in = [up.astype(jnp.float32).reshape(N, Cin, HW)]

    res_elems = {"none": 0, "add": 2 * Cin * HW, "interp": 2 * Cin * hsws}[mode]
    per_img = 4 * (2 * Cin * HW + 2 * Cout * HW + Cin * HW + res_elems)
    nb, lane_out = _pick_batch_block(N, HW, per_img)
    grid = N // nb
    padl = ((W + 1 + 127) // 128) * 128   # lane-aligned halo covering row over/underflow

    in_specs = [pl.BlockSpec((nb, Cin, HW), lambda n: (n, 0, 0))]
    if mode == "add":
        in_specs.append(pl.BlockSpec((nb, Cin, HW), lambda n: (n, 0, 0)))
    elif mode == "interp":
        in_specs.append(pl.BlockSpec((nb, Cin, hsws), lambda n: (n, 0, 0)))
        in_specs.append(pl.BlockSpec((hsws, HW), lambda n: (0, 0)))
    in_specs += [
        pl.BlockSpec((Cin, 9), lambda n: (0, 0)),
        pl.BlockSpec((Cout, Cin), lambda n: (0, 0)),
        pl.BlockSpec((Cout, 1), lambda n: (0, 0)),
    ]

    if lane_out:
        out_shape = jax.ShapeDtypeStruct((Cout, N * HW), jnp.float32)
        out_spec = pl.BlockSpec((Cout, nb * HW), lambda n: (0, n))
    else:
        out_shape = jax.ShapeDtypeStruct((N, Cout, HW), jnp.float32)
        out_spec = pl.BlockSpec((nb, Cout, HW), lambda n: (n, 0, 0))

    kernel = functools.partial(_dwsep_kernel, H=H, W=W, Cin=Cin, Cout=Cout, NB=nb,
                               PADL=padl, MODE=mode, LANE_OUT=lane_out)

    out = pl.pallas_call(
        kernel,
        out_shape=out_shape,
        grid_spec=pltpu.PrefetchScalarGridSpec(
            num_scalar_prefetch=0,
            grid=(grid,),
            in_specs=in_specs,
            out_specs=out_spec,
            scratch_shapes=[
                pltpu.VMEM((Cin, HW + 2 * padl), jnp.float32),   # zero-haloed dw staging line
                pltpu.VMEM((Cin, nb * HW), jnp.float32),         # batched depthwise result
            ],
        ),
        compiler_params=pltpu.CompilerParams(
            dimension_semantics=("parallel",),
            vmem_limit_bytes=32 * 1024 * 1024,
        ),
    )(x_flat, *extra_in, wdw, w_eff, b_eff)

    if lane_out:
        out = out.reshape(Cout, N, HW).transpose(1, 0, 2)   # tiny level: layout plumbing only
    return out.reshape(N, Cout, H, W)


# ---------------------------------------------------------------------------
# IterativeHead: params + forward
# ---------------------------------------------------------------------------
def init_iterative_head_params(key, in_channels):
    rev = list(in_channels[::-1])
    n = len(rev)
    params = []
    for i in range(n):
        cin = rev[i]
        cout = rev[i + 1] if i != n - 1 else rev[i]
        key, kdw, kpw, kg1, kb1, km1, kv1, kg2, kb2, km2, kv2 = jax.random.split(key, 11)
        dw_w = jax.random.normal(kdw, (cin, 1, 3, 3), jnp.float32) / np.sqrt(9.0)
        pw_w = jax.random.normal(kpw, (cout, cin, 1, 1), jnp.float32) / np.sqrt(cin)
        bn1 = (1.0 + 0.1 * jax.random.normal(kg1, (cin,), jnp.float32),
               0.1 * jax.random.normal(kb1, (cin,), jnp.float32),
               0.1 * jax.random.normal(km1, (cin,), jnp.float32),
               jnp.abs(1.0 + 0.1 * jax.random.normal(kv1, (cin,), jnp.float32)))
        bn2 = (1.0 + 0.1 * jax.random.normal(kg2, (cout,), jnp.float32),
               0.1 * jax.random.normal(kb2, (cout,), jnp.float32),
               0.1 * jax.random.normal(km2, (cout,), jnp.float32),
               jnp.abs(1.0 + 0.1 * jax.random.normal(kv2, (cout,), jnp.float32)))
        params.append(dict(dw_w=dw_w, pw_w=pw_w, bn1=bn1, bn2=bn2))
    return params


def iterative_head_forward(xs, params, eps=1e-5):
    """xs: list of (N, C_i, H_i, W_i), highest resolution first (as in the PyTorch module)."""
    xs = xs[::-1]
    y = []
    last = None
    for i, s in enumerate(xs):
        p = params[i]
        s = dwsep_conv_bn_relu(s, p["dw_w"], p["bn1"], p["pw_w"], p["bn2"],
                               last=last, eps=eps)
        y.append(s)
        last = s
    return y[::-1]


# ---------------------------------------------------------------------------
# Pure-JAX reference (no Pallas) for verification.
# ---------------------------------------------------------------------------
def _ref_bn(x, bn, eps):
    g, b, m, v = bn
    s = g / jnp.sqrt(v + eps)
    return x * s.reshape(1, -1, 1, 1) + (b - m * s).reshape(1, -1, 1, 1)


def _ref_dwsep(x, dw_w, bn1, pw_w, bn2, eps):
    C = x.shape[1]
    d = lax.conv_general_dilated(x, dw_w, (1, 1), ((1, 1), (1, 1)),
                                 dimension_numbers=("NCHW", "OIHW", "NCHW"),
                                 feature_group_count=C)
    d = _ref_bn(d, bn1, eps)
    p = lax.conv_general_dilated(d, pw_w, (1, 1), ((0, 0), (0, 0)),
                                 dimension_numbers=("NCHW", "OIHW", "NCHW"))
    return jnp.maximum(_ref_bn(p, bn2, eps), 0.0)


def _ref_upsample(x, size):
    N, C, Hs, Ws = x.shape
    Ht, Wt = size
    if (Hs, Ws) == (Ht, Wt):
        return x
    ys = jnp.linspace(0.0, Hs - 1.0, Ht)
    xs = jnp.linspace(0.0, Ws - 1.0, Wt)
    y0 = jnp.floor(ys).astype(jnp.int32)
    y1 = jnp.minimum(y0 + 1, Hs - 1)
    wy = ys - y0
    x0 = jnp.floor(xs).astype(jnp.int32)
    x1 = jnp.minimum(x0 + 1, Ws - 1)
    wx = xs - x0
    rows = (jnp.take(x, y0, axis=2) * (1.0 - wy)[None, None, :, None]
            + jnp.take(x, y1, axis=2) * wy[None, None, :, None])
    return (jnp.take(rows, x0, axis=3) * (1.0 - wx)[None, None, None, :]
            + jnp.take(rows, x1, axis=3) * wx[None, None, None, :])


def _ref_forward(xs, params, eps=1e-5):
    xs = xs[::-1]
    y = []
    last = None
    for i, s in enumerate(xs):
        if last is not None:
            s = s + _ref_upsample(last, s.shape[-2:])
        p = params[i]
        s = _ref_dwsep(s, p["dw_w"], p["bn1"], p["pw_w"], p["bn2"], eps)
        y.append(s)
        last = s
    return y[::-1]


if __name__ == "__main__":
    key = jax.random.PRNGKey(0)
    kp, k0, k1, k2 = jax.random.split(key, 4)

    N = 2
    in_channels = [4, 8, 16]                    # highest resolution / fewest channels first
    spatial = [(32, 32), (16, 16), (8, 8)]      # resolution halves as channels double

    xs = [jax.random.normal(k, (N, c, h, w), jnp.float32)
          for k, c, (h, w) in zip([k0, k1, k2], in_channels, spatial)]
    params = init_iterative_head_params(kp, in_channels)

    ys = iterative_head_forward(xs, params)
    ys = jax.block_until_ready(ys)

    refs = _ref_forward(xs, params)
    for got, want in zip(ys, refs):
        np.testing.assert_allclose(np.asarray(got), np.asarray(want), atol=1e-3, rtol=1e-3)

    print("KERNEL_OK")
</pallas_src>

<mosaic_0001>
module attributes {stable_mosaic.version = 11 : i64} {
  func.func @_dwsep_kernel(%arg0: i32, %arg1: memref<2x16x64xf32, #tpu.memory_space<vmem>>, %arg2: memref<16x9xf32, #tpu.memory_space<vmem>>, %arg3: memref<8x16xf32, #tpu.memory_space<vmem>>, %arg4: memref<8x1xf32, #tpu.memory_space<vmem>>, %arg5: memref<8x128xf32, #tpu.memory_space<vmem>>, %arg6: memref<16x320xf32, #tpu.memory_space<vmem>>, %arg7: memref<16x128xf32, #tpu.memory_space<vmem>>) attributes {dimension_semantics = [#tpu.dimension_semantics<parallel>], iteration_bounds = array<i64: 1>, scalar_prefetch = 0 : i64, scratch_operands = 2 : i64, tpu.core_type = #tpu.core_type<tc>, window_params = [{transform_indices = @transform_0, window_bounds = array<i64: 2, 16, 64>}, {pipeline_mode = #tpu.pipeline_mode<synchronous>, transform_indices = @transform_1, window_bounds = array<i64: 16, 9>}, {pipeline_mode = #tpu.pipeline_mode<synchronous>, transform_indices = @transform_2, window_bounds = array<i64: 8, 16>}, {pipeline_mode = #tpu.pipeline_mode<synchronous>, transform_indices = @transform_3, window_bounds = array<i64: 8, 1>}, {transform_indices = @transform_4, window_bounds = array<i64: 8, 128>}]} {
    %cst = arith.constant 0.000000e+00 : f32
    %0 = vector.broadcast %cst : f32 to vector<16x128xf32>
    %c0 = arith.constant 0 : index
    %c0_0 = arith.constant 0 : index
    %1 = vector.load %arg6[%c0, %c0_0] : memref<16x320xf32, #tpu.memory_space<vmem>>, vector<16x128xf32>
    tpu.vector_store %arg6[%c0, %c0_0], %0 {strides = array<i32>} : memref<16x320xf32, #tpu.memory_space<vmem>>, vector<16x128xf32>,
    %cst_1 = arith.constant 0.000000e+00 : f32
    %2 = vector.broadcast %cst_1 : f32 to vector<16x128xf32>
    %c0_2 = arith.constant 0 : index
    %c192 = arith.constant 192 : index
    %3 = vector.load %arg6[%c0_2, %c192] : memref<16x320xf32, #tpu.memory_space<vmem>>, vector<16x128xf32>
    tpu.vector_store %arg6[%c0_2, %c192], %2 {strides = array<i32>} : memref<16x320xf32, #tpu.memory_space<vmem>>, vector<16x128xf32>,
    %c0_3 = arith.constant 0 : index
    %c0_4 = arith.constant 0 : index
    %4 = vector.load %arg2[%c0_3, %c0_4] : memref<16x9xf32, #tpu.memory_space<vmem>>, vector<16x9xf32>
    %c0_5 = arith.constant 0 : index
    %c0_6 = arith.constant 0 : index
    %5 = vector.load %arg3[%c0_5, %c0_6] : memref<8x16xf32, #tpu.memory_space<vmem>>, vector<8x16xf32>
    %c0_7 = arith.constant 0 : index
    %c0_8 = arith.constant 0 : index
    %6 = vector.load %arg4[%c0_7, %c0_8] : memref<8x1xf32, #tpu.memory_space<vmem>>, vector<8x1xf32>
    %7 = tpu.iota {dimensions = array<i32: 1>} : vector<16x64xi32>
    %c8_i32 = arith.constant 8 : i32
    %c0_i32 = arith.constant 0 : i32
    %8 = arith.cmpi eq, %c8_i32, %c0_i32 : i32
    %c1_i32 = arith.constant 1 : i32
    %9 = arith.select %8, %c1_i32, %c8_i32 : i32
    %10 = vector.broadcast %9 : i32 to vector<16x64xi32>
    %11 = arith.remsi %7, %10 : vector<16x64xi32>
    %c0_i32_9 = arith.constant 0 : i32
    %12 = vector.broadcast %c0_i32_9 : i32 to vector<16x64xi32>
    %13 = arith.cmpi ne, %11, %12 : vector<16x64xi32>
    %c0_i32_10 = arith.constant 0 : i32
    %14 = vector.broadcast %c0_i32_10 : i32 to vector<16x64xi32>
    %15 = arith.cmpi slt, %11, %14 : vector<16x64xi32>
    %c0_i32_11 = arith.constant 0 : i32
    %16 = arith.cmpi slt, %9, %c0_i32_11 : i32
    %17 = vector.broadcast %16 : i1 to vector<16x64xi1>
    %18 = vector.broadcast %17 : vector<16x64xi1> to vector<16x64xi1>
    %19 = arith.xori %15, %18 : vector<16x64xi1>
    %20 = arith.andi %19, %13 : vector<16x64xi1>
    %21 = vector.broadcast %9 : i32 to vector<16x64xi32>
    %22 = arith.addi %11, %21 : vector<16x64xi32>
    %23 = arith.select %20, %22, %11 : vector<16x64xi1>, vector<16x64xi32>
    %c1_i32_12 = arith.constant 1 : i32
    %24 = vector.broadcast %c1_i32_12 : i32 to vector<16x64xi32>
    %25 = arith.cmpi sge, %23, %24 : vector<16x64xi32>
    %c7_i32 = arith.constant 7 : i32
    %26 = vector.broadcast %c7_i32 : i32 to vector<16x64xi32>
    %27 = arith.cmpi slt, %23, %26 : vector<16x64xi32>
    %c0_13 = arith.constant 0 : index
    %c0_14 = arith.constant 0 : index
    %c0_15 = arith.constant 0 : index
    %28 = vector.load %arg1[%c0_13, %c0_14, %c0_15] : memref<2x16x64xf32, #tpu.memory_space<vmem>>, vector<1x16x64xf32>
    %29 = vector.shape_cast %28 : vector<1x16x64xf32> to vector<16x64xf32>
    %c0_16 = arith.constant 0 : index
    %c128 = arith.constant 128 : index
    %30 = vector.load %arg6[%c0_16, %c128] : memref<16x320xf32, #tpu.memory_space<vmem>>, vector<16x64xf32>
    tpu.vector_store %arg6[%c0_16, %c128], %29 {strides = array<i32>} : memref<16x320xf32, #tpu.memory_space<vmem>>, vector<16x64xf32>,
    %cst_17 = arith.constant 0.000000e+00 : f32
    %31 = vector.broadcast %cst_17 : f32 to vector<16x64xf32>
    %cst_18 = arith.constant 0.000000e+00 : f32
    %32 = vector.broadcast %cst_18 : f32 to vector<16x64xf32>
    %cst_19 = arith.constant 0.000000e+00 : f32
    %33 = vector.broadcast %cst_19 : f32 to vector<16x64xf32>
    %c0_20 = arith.constant 0 : index
    %c119 = arith.constant 119 : index
    %34 = vector.load %arg6[%c0_20, %c119] : memref<16x320xf32, #tpu.memory_space<vmem>>, vector<16x64xf32>
    %35 = vector.extract_strided_slice %4 {offsets = [0, 0], sizes = [16, 1], strides = [1, 1]} : vector<16x9xf32> to vector<16x1xf32>
    %36 = vector.broadcast %35 : vector<16x1xf32> to vector<16x64xf32>
    %37 = arith.mulf %34, %36 : vector<16x64xf32>
    %38 = arith.addf %31, %37 : vector<16x64xf32>
    %c0_21 = arith.constant 0 : index
    %c120 = arith.constant 120 : index
    %39 = vector.load %arg6[%c0_21, %c120] : memref<16x320xf32, #tpu.memory_space<vmem>>, vector<16x64xf32>
    %40 = vector.extract_strided_slice %4 {offsets = [0, 1], sizes = [16, 1], strides = [1, 1]} : vector<16x9xf32> to vector<16x1xf32>
    %41 = vector.broadcast %40 : vector<16x1xf32> to vector<16x64xf32>
    %42 = arith.mulf %39, %41 : vector<16x64xf32>
    %43 = arith.addf %32, %42 : vector<16x64xf32>
    %c0_22 = arith.constant 0 : index
    %c121 = arith.constant 121 : index
    %44 = vector.load %arg6[%c0_22, %c121] : memref<16x320xf32, #tpu.memory_space<vmem>>, vector<16x64xf32>
    %45 = vector.extract_strided_slice %4 {offsets = [0, 2], sizes = [16, 1], strides = [1, 1]} : vector<16x9xf32> to vector<16x1xf32>
    %46 = vector.broadcast %45 : vector<16x1xf32> to vector<16x64xf32>
    %47 = arith.mulf %44, %46 : vector<16x64xf32>
    %48 = arith.addf %33, %47 : vector<16x64xf32>
    %c0_23 = arith.constant 0 : index
    %c127 = arith.constant 127 : index
    %49 = vector.load %arg6[%c0_23, %c127] : memref<16x320xf32, #tpu.memory_space<vmem>>, vector<16x64xf32>
    %50 = vector.extract_strided_slice %4 {offsets = [0, 3], sizes = [16, 1], strides = [1, 1]} : vector<16x9xf32> to vector<16x1xf32>
    %51 = vector.broadcast %50 : vector<16x1xf32> to vector<16x64xf32>
    %52 = arith.mulf %49, %51 : vector<16x64xf32>
    %53 = arith.addf %38, %52 : vector<16x64xf32>
    %c0_24 = arith.constant 0 : index
    %c128_25 = arith.constant 128 : index
    %54 = vector.load %arg6[%c0_24, %c128_25] : memref<16x320xf32, #tpu.memory_space<vmem>>, vector<16x64xf32>
    %55 = vector.extract_strided_slice %4 {offsets = [0, 4], sizes = [16, 1], strides = [1, 1]} : vector<16x9xf32> to vector<16x1xf32>
    %56 = vector.broadcast %55 : vector<16x1xf32> to vector<16x64xf32>
    %57 = arith.mulf %54, %56 : vector<16x64xf32>
    %58 = arith.addf %43, %57 : vector<16x64xf32>
    %c0_26 = arith.constant 0 : index
    %c129 = arith.constant 129 : index
    %59 = vector.load %arg6[%c0_26, %c129] : memref<16x320xf32, #tpu.memory_space<vmem>>, vector<16x64xf32>
    %60 = vector.extract_strided_slice %4 {offsets = [0, 5], sizes = [16, 1], strides = [1, 1]} : vector<16x9xf32> to vector<16x1xf32>
    %61 = vector.broadcast %60 : vector<16x1xf32> to vector<16x64xf32>
    %62 = arith.mulf %59, %61 : vector<16x64xf32>
    %63 = arith.addf %48, %62 : vector<16x64xf32>
    %c0_27 = arith.constant 0 : index
    %c135 = arith.constant 135 : index
    %64 = vector.load %arg6[%c0_27, %c135] : memref<16x320xf32, #tpu.memory_space<vmem>>, vector<16x64xf32>
    %65 = vector.extract_strided_slice %4 {offsets = [0, 6], sizes = [16, 1], strides = [1, 1]} : vector<16x9xf32> to vector<16x1xf32>
    %66 = vector.broadcast %65 : vector<16x1xf32> to vector<16x64xf32>
    %67 = arith.mulf %64, %66 : vector<16x64xf32>
    %68 = arith.addf %53, %67 : vector<16x64xf32>
    %c0_28 = arith.constant 0 : index
    %c136 = arith.constant 136 : index
    %69 = vector.load %arg6[%c0_28, %c136] : memref<16x320xf32, #tpu.memory_space<vmem>>, vector<16x64xf32>
    %70 = vector.extract_strided_slice %4 {offsets = [0, 7], sizes = [16, 1], strides = [1, 1]} : vector<16x9xf32> to vector<16x1xf32>
    %71 = vector.broadcast %70 : vector<16x1xf32> to vector<16x64xf32>
    %72 = arith.mulf %69, %71 : vector<16x64xf32>
    %73 = arith.addf %58, %72 : vector<16x64xf32>
    %c0_29 = arith.constant 0 : index
    %c137 = arith.constant 137 : index
    %74 = vector.load %arg6[%c0_29, %c137] : memref<16x320xf32, #tpu.memory_space<vmem>>, vector<16x64xf32>
    %75 = vector.extract_strided_slice %4 {offsets = [0, 8], sizes = [16, 1], strides = [1, 1]} : vector<16x9xf32> to vector<16x1xf32>
    %76 = vector.broadcast %75 : vector<16x1xf32> to vector<16x64xf32>
    %77 = arith.mulf %74, %76 : vector<16x64xf32>
    %78 = arith.addf %63, %77 : vector<16x64xf32>
    %cst_30 = arith.constant 0.000000e+00 : f32
    %79 = vector.broadcast %cst_30 : f32 to vector<16x64xf32>
    %80 = arith.select %25, %68, %79 : vector<16x64xi1>, vector<16x64xf32>
    %81 = arith.addf %80, %73 : vector<16x64xf32>
    %cst_31 = arith.constant 0.000000e+00 : f32
    %82 = vector.broadcast %cst_31 : f32 to vector<16x64xf32>
    %83 = arith.select %27, %78, %82 : vector<16x64xi1>, vector<16x64xf32>
    %84 = arith.addf %81, %83 : vector<16x64xf32>
    %c0_32 = arith.constant 0 : index
    %c0_33 = arith.constant 0 : index
    %85 = vector.load %arg7[%c0_32, %c0_33] : memref<16x128xf32, #tpu.memory_space<vmem>>, vector<16x64xf32>
    tpu.vector_store %arg7[%c0_32, %c0_33], %84 {strides = array<i32>} : memref<16x128xf32, #tpu.memory_space<vmem>>, vector<16x64xf32>,
    %c1 = arith.constant 1 : index
    %c0_34 = arith.constant 0 : index
    %c0_35 = arith.constant 0 : index
    %86 = vector.load %arg1[%c1, %c0_34, %c0_35] : memref<2x16x64xf32, #tpu.memory_space<vmem>>, vector<1x16x64xf32>
    %87 = vector.shape_cast %86 : vector<1x16x64xf32> to vector<16x64xf32>
    %c0_36 = arith.constant 0 : index
    %c128_37 = arith.constant 128 : index
    %88 = vector.load %arg6[%c0_36, %c128_37] : memref<16x320xf32, #tpu.memory_space<vmem>>, vector<16x64xf32>
    tpu.vector_store %arg6[%c0_36, %c128_37], %87 {strides = array<i32>} : memref<16x320xf32, #tpu.memory_space<vmem>>, vector<16x64xf32>,
    %cst_38 = arith.constant 0.000000e+00 : f32
    %89 = vector.broadcast %cst_38 : f32 to vector<16x64xf32>
    %cst_39 = arith.constant 0.000000e+00 : f32
    %90 = vector.broadcast %cst_39 : f32 to vector<16x64xf32>
    %cst_40 = arith.constant 0.000000e+00 : f32
    %91 = vector.broadcast %cst_40 : f32 to vector<16x64xf32>
    %c0_41 = arith.constant 0 : index
    %c119_42 = arith.constant 119 : index
    %92 = vector.load %arg6[%c0_41, %c119_42] : memref<16x320xf32, #tpu.memory_space<vmem>>, vector<16x64xf32>
    %93 = vector.extract_strided_slice %4 {offsets = [0, 0], sizes = [16, 1], strides = [1, 1]} : vector<16x9xf32> to vector<16x1xf32>
    %94 = vector.broadcast %93 : vector<16x1xf32> to vector<16x64xf32>
    %95 = arith.mulf %92, %94 : vector<16x64xf32>
    %96 = arith.addf %89, %95 : vector<16x64xf32>
    %c0_43 = arith.constant 0 : index
    %c120_44 = arith.constant 120 : index
    %97 = vector.load %arg6[%c0_43, %c120_44] : memref<16x320xf32, #tpu.memory_space<vmem>>, vector<16x64xf32>
    %98 = vector.extract_strided_slice %4 {offsets = [0, 1], sizes = [16, 1], strides = [1, 1]} : vector<16x9xf32> to vector<16x1xf32>
    %99 = vector.broadcast %98 : vector<16x1xf32> to vector<16x64xf32>
    %100 = arith.mulf %97, %99 : vector<16x64xf32>
    %101 = arith.addf %90, %100 : vector<16x64xf32>
    %c0_45 = arith.constant 0 : index
    %c121_46 = arith.constant 121 : index
    %102 = vector.load %arg6[%c0_45, %c121_46] : memref<16x320xf32, #tpu.memory_space<vmem>>, vector<16x64xf32>
    %103 = vector.extract_strided_slice %4 {offsets = [0, 2], sizes = [16, 1], strides = [1, 1]} : vector<16x9xf32> to vector<16x1xf32>
    %104 = vector.broadcast %103 : vector<16x1xf32> to vector<16x64xf32>
    %105 = arith.mulf %102, %104 : vector<16x64xf32>
    %106 = arith.addf %91, %105 : vector<16x64xf32>
    %c0_47 = arith.constant 0 : index
    %c127_48 = arith.constant 127 : index
    %107 = vector.load %arg6[%c0_47, %c127_48] : memref<16x320xf32, #tpu.memory_space<vmem>>, vector<16x64xf32>
    %108 = vector.extract_strided_slice %4 {offsets = [0, 3], sizes = [16, 1], strides = [1, 1]} : vector<16x9xf32> to vector<16x1xf32>
    %109 = vector.broadcast %108 : vector<16x1xf32> to vector<16x64xf32>
    %110 = arith.mulf %107, %109 : vector<16x64xf32>
    %111 = arith.addf %96, %110 : vector<16x64xf32>
    %c0_49 = arith.constant 0 : index
    %c128_50 = arith.constant 128 : index
    %112 = vector.load %arg6[%c0_49, %c128_50] : memref<16x320xf32, #tpu.memory_space<vmem>>, vector<16x64xf32>
    %113 = vector.extract_strided_slice %4 {offsets = [0, 4], sizes = [16, 1], strides = [1, 1]} : vector<16x9xf32> to vector<16x1xf32>
    %114 = vector.broadcast %113 : vector<16x1xf32> to vector<16x64xf32>
    %115 = arith.mulf %112, %114 : vector<16x64xf32>
    %116 = arith.addf %101, %115 : vector<16x64xf32>
    %c0_51 = arith.constant 0 : index
    %c129_52 = arith.constant 129 : index
    %117 = vector.load %arg6[%c0_51, %c129_52] : memref<16x320xf32, #tpu.memory_space<vmem>>, vector<16x64xf32>
    %118 = vector.extract_strided_slice %4 {offsets = [0, 5], sizes = [16, 1], strides = [1, 1]} : vector<16x9xf32> to vector<16x1xf32>
    %119 = vector.broadcast %118 : vector<16x1xf32> to vector<16x64xf32>
    %120 = arith.mulf %117, %119 : vector<16x64xf32>
    %121 = arith.addf %106, %120 : vector<16x64xf32>
    %c0_53 = arith.constant 0 : index
    %c135_54 = arith.constant 135 : index
    %122 = vector.load %arg6[%c0_53, %c135_54] : memref<16x320xf32, #tpu.memory_space<vmem>>, vector<16x64xf32>
    %123 = vector.extract_strided_slice %4 {offsets = [0, 6], sizes = [16, 1], strides = [1, 1]} : vector<16x9xf32> to vector<16x1xf32>
    %124 = vector.broadcast %123 : vector<16x1xf32> to vector<16x64xf32>
    %125 = arith.mulf %122, %124 : vector<16x64xf32>
    %126 = arith.addf %111, %125 : vector<16x64xf32>
    %c0_55 = arith.constant 0 : index
    %c136_56 = arith.constant 136 : index
    %127 = vector.load %arg6[%c0_55, %c136_56] : memref<16x320xf32, #tpu.memory_space<vmem>>, vector<16x64xf32>
    %128 = vector.extract_strided_slice %4 {offsets = [0, 7], sizes = [16, 1], strides = [1, 1]} : vector<16x9xf32> to vector<16x1xf32>
    %129 = vector.broadcast %128 : vector<16x1xf32> to vector<16x64xf32>
    %130 = arith.mulf %127, %129 : vector<16x64xf32>
    %131 = arith.addf %116, %130 : vector<16x64xf32>
    %c0_57 = arith.constant 0 : index
    %c137_58 = arith.constant 137 : index
    %132 = vector.load %arg6[%c0_57, %c137_58] : memref<16x320xf32, #tpu.memory_space<vmem>>, vector<16x64xf32>
    %133 = vector.extract_strided_slice %4 {offsets = [0, 8], sizes = [16, 1], strides = [1, 1]} : vector<16x9xf32> to vector<16x1xf32>
    %134 = vector.broadcast %133 : vector<16x1xf32> to vector<16x64xf32>
    %135 = arith.mulf %132, %134 : vector<16x64xf32>
    %136 = arith.addf %121, %135 : vector<16x64xf32>
    %cst_59 = arith.constant 0.000000e+00 : f32
    %137 = vector.broadcast %cst_59 : f32 to vector<16x64xf32>
    %138 = arith.select %25, %126, %137 : vector<16x64xi1>, vector<16x64xf32>
    %139 = arith.addf %138, %131 : vector<16x64xf32>
    %cst_60 = arith.constant 0.000000e+00 : f32
    %140 = vector.broadcast %cst_60 : f32 to vector<16x64xf32>
    %141 = arith.select %27, %136, %140 : vector<16x64xi1>, vector<16x64xf32>
    %142 = arith.addf %139, %141 : vector<16x64xf32>
    %c0_61 = arith.constant 0 : index
    %c64 = arith.constant 64 : index
    %143 = vector.load %arg7[%c0_61, %c64] : memref<16x128xf32, #tpu.memory_space<vmem>>, vector<16x64xf32>
    tpu.vector_store %arg7[%c0_61, %c64], %142 {strides = array<i32>} : memref<16x128xf32, #tpu.memory_space<vmem>>, vector<16x64xf32>,
    %c0_62 = arith.constant 0 : index
    %c0_63 = arith.constant 0 : index
    %144 = vector.load %arg7[%c0_62, %c0_63] : memref<16x128xf32, #tpu.memory_space<vmem>>, vector<16x128xf32>
    %cst_64 = arith.constant dense<0.000000e+00> : vector<8x128xf32>
    %145 = tpu.matmul %5, %144, %cst_64 {dimension_numbers = #tpu.dot_dimension_numbers<[1], [0], [0], [1], [0, 0, 1, 1], [], []>} : vector<8x16xf32>, vector<16x128xf32>, vector<8x128xf32> -> vector<8x128xf32>
    %146 = vector.broadcast %6 : vector<8x1xf32> to vector<8x128xf32>
    %147 = arith.addf %145, %146 : vector<8x128xf32>
    %cst_65 = arith.constant 0.000000e+00 : f32
    %148 = vector.broadcast %cst_65 : f32 to vector<8x128xf32>
    %149 = arith.maximumf %147, %148 : vector<8x128xf32>
    %c0_66 = arith.constant 0 : index
    %c0_67 = arith.constant 0 : index
    %150 = vector.load %arg5[%c0_66, %c0_67] : memref<8x128xf32, #tpu.memory_space<vmem>>, vector<8x128xf32>
    tpu.vector_store %arg5[%c0_66, %c0_67], %149 {strides = array<i32>} : memref<8x128xf32, #tpu.memory_space<vmem>>, vector<8x128xf32>,
    return
  }
  func.func @transform_0(%arg0: i32) -> (i32, i32, i32) {
    %c0_i32 = arith.constant 0 : i32
    %c0_i32_0 = arith.constant 0 : i32
    %c0_i32_1 = arith.constant 0 : i32
    return %arg0, %c0_i32, %c0_i32_0 : i32, i32, i32
  }
  func.func @transform_1(%arg0: i32) -> (i32, i32) {
    %c0_i32 = arith.constant 0 : i32
    %c0_i32_0 = arith.constant 0 : i32
    %c0_i32_1 = arith.constant 0 : i32
    return %c0_i32, %c0_i32_0 : i32, i32
  }
  func.func @transform_2(%arg0: i32) -> (i32, i32) {
    %c0_i32 = arith.constant 0 : i32
    %c0_i32_0 = arith.constant 0 : i32
    %c0_i32_1 = arith.constant 0 : i32
    return %c0_i32, %c0_i32_0 : i32, i32
  }
  func.func @transform_3(%arg0: i32) -> (i32, i32) {
    %c0_i32 = arith.constant 0 : i32
    %c0_i32_0 = arith.constant 0 : i32
    %c0_i32_1 = arith.constant 0 : i32
    return %c0_i32, %c0_i32_0 : i32, i32
  }
  func.func @transform_4(%arg0: i32) -> (i32, i32) {
    %c0_i32 = arith.constant 0 : i32
    %c0_i32_0 = arith.constant 0 : i32
    return %c0_i32, %arg0 : i32, i32
  }
}

</mosaic_0001>

<bundles_post_ra>
// kernel: tpu_custom_call.1
= control target key start
LH: loop header
LB: loop body
LE: loop exit
PB: predicated region body
PF: predicated region fallthrough
CT: control target
= control target key end

     0   :  { %9 = vsyncpa [#allocation5], 0  ;;  %s1042_s0 = inlined_call_operand.hbm [shape: f32[2,16,64], index: 0, kind: input, shape index: {}]   ;;  %s1043_s1 = inlined_call_operand.hbm [shape: f32[16,9], index: 1, kind: input, shape index: {}]   ;;  %s1044_s2 = inlined_call_operand.vmem [shape: f32[8,16], index: 2, kind: input, shape index: {}]   ;;  %s1045_s3 = inlined_call_operand.vmem [shape: f32[8,1], index: 3, kind: input, shape index: {}]   ;;  %s1046_s4 = inlined_call_operand.hbm [shape: f32[8,128], index: 4, kind: output, shape index: {}]  }
   0x1   :  { %10 = vsyncpa [#allocation8], 0 }
   0x2   :  { %11 = vsyncpa [#allocation6], 0  ;;  %s756_s15 = smov [#allocation4]   ;;  %s684_s19 = scalar_lea.hbm %s1042_s0, 512 }
   0x3   :  { %s17_s16 = sshll.u32 %s756_s15, 4  ;;  %p685_p0 = scmp.ne.s32.totalorder %s1042_s0, %s684_s19  ;;  %s18_s16 = int_to_ptr.vmem [resolvable:$true] %s17_s16 }
   0x4   :  { %p688_p1 = scmp.lt.u32.totalorder %s684_s19, %s1042_s0 }
   0x6   :  { %p690_p2 = pnand %p688_p1, %p685_p0 }
   0x8   :  { %693 = shalt.err (!%p690_p2)
}
   0x9   :  { %s694_s24 = scalar_lea.vmem %s18_s16, 512  ;;  %p699_p4 = scmp.lt.s32.totalorder %s18_s16, %s18_s16 }
   0xa   :  { %p695_p3 = scmp.ne.s32.totalorder %s18_s16, %s694_s24  ;;  %p700_p5 = scmp.lt.s32.totalorder %s694_s24, %s694_s24 }
   0xc   :  { %p701_p6 = por %p700_p5, %p699_p4 }
   0xe   :  { %p702_p7 = pnand %p701_p6, %p695_p3 }
  0x10   :  { %705 = shalt.err (!%p702_p7)
}
  0x11   :  { %s757_s25 = smov 128   ;;  %s758_s26 = smov 8  }
  0x12   :  { %23 = dma.hbm_to_vmem [thread:$0]  %s1042_s0, 512, %s18_s16, [#allocation5], %s757_s25, %s757_s25, %s758_s26  }
  0x13   :  { %s759_s29 = smov [#allocation7]   ;;  %s706_s7 = scalar_lea.hbm %s1043_s1, 256 }
  0x14   :  { %s29_s30 = sshll.u32 %s759_s29, 4  ;;  %p707_p8 = scmp.ne.s32.totalorder %s1043_s1, %s706_s7  ;;  %s30_s30 = int_to_ptr.vmem [resolvable:$true] %s29_s30 }
  0x15   :  { %p710_p9 = scmp.lt.u32.totalorder %s706_s7, %s1043_s1 }
  0x17   :  { %p712_p10 = pnand %p710_p9, %p707_p8 }
  0x19   :  { %715 = shalt.err (!%p712_p10)
}
  0x1a   :  { %s716_s12 = scalar_lea.vmem %s30_s30, 256  ;;  %p721_p12 = scmp.lt.s32.totalorder %s30_s30, %s30_s30 }
  0x1b   :  { %p717_p11 = scmp.ne.s32.totalorder %s30_s30, %s716_s12  ;;  %p722_p13 = scmp.lt.s32.totalorder %s716_s12, %s716_s12 }
  0x1d   :  { %p723_p0 = por %p722_p13, %p721_p12 }
  0x1f   :  { %p724_p1 = pnand %p723_p0, %p717_p11 }
  0x21   :  { %727 = shalt.err (!%p724_p1)
}
  0x22   :  { %35 = dma.hbm_to_vmem [thread:$0]  %s1043_s1, 256, %s30_s30, [#allocation8], %s757_s25, %s757_s25, %s758_s26  }
  0x23   :  { %750 = dma.done.wait [#allocation5], 512  }
  0x24   :  { %751 = vsyncadd [#allocation5], 4294966784 }
  0x25   :  { %752 = dma.done.wait [#allocation8], 256  }
  0x26   :  { %753 = vsyncadd [#allocation8], 4294967040  ;;  %v760_v0 = vmov 4   ;;  %v761_v1 = vmov 3   ;;  %vm48_vm0 = vcmask 1048064   ;;  %vm50_vm1 = vcmask 523264  }
  0x27   :  { %669 = vset.pattern.permute.xlu1 %v760_v0  ;;  %668 = vset.pattern.permute.xlu0 %v761_v1  ;;  %v762_v2 = vmov 0.0   ;;  %v54_v3 = vld [vmem:[#allocation7] sm:$0xff]  ;;  %v75_v5 = vld [vmem:[#allocation4 + $0x8] sm:$0xff]  ;;  %v339_v7 = vld [vmem:[#allocation4 + $0x10] sm:$0xff]  ;;  %v763_v10 = vmov 5   ;;  %v764_v12 = vmov 6  }
  0x28   :  { %49 = vst.msk [vmem:[#allocation2 + $0x8] sm:$0xff] %vm48_vm0, %v762_v2  ;;  %52 = vst.msk [vmem:[#allocation2 + $0x20] sm:$0xff] %vm48_vm0, %v762_v2  ;;  %v74_v4 = vld [vmem:[#allocation4] sm:$0xff]  ;;  %168 = vperm.xlu1 %669, %v54_v3   ;;  %133 = vperm.xlu0 %668, %v54_v3   ;;  %v55_v6 = vld [vmem:[#allocation7 + $0x8] sm:$0xff]  ;;  %v765_v13 = vmov 7   ;;  %v766_v14 = vmov 8  }
  0x29   :  { %76 = vst.msk [vmem:[#allocation2 + $0x8] sm:$0xff] %vm50_vm1, %v74_v4  ;;  %77 = vst.msk [vmem:[#allocation2 + $0x20] sm:$0xff] %vm50_vm1, %v75_v5  ;;  %v340_v8 = vld [vmem:[#allocation4 + $0x18] sm:$0xff]  ;;  %v767_v15 = vmov 0   ;;  %v768_v16 = vmov 2   ;;  %v769_v17 = vmov 1  }
  0x2a   :  { %s770_s1 = smov 120   ;;  %s771_s14 = smov 112   ;;  %vm156_vm2 = vcmask 982016   ;;  %vm327_vm3 = vcmask 56320   ;;  %vm289_vm4 = vcmask 72704   ;;  %vm308_vm5 = vcmask 64512  }
  0x2b   :  { %s772_s15 = smov 9   ;;  %s773_s16 = smov 7   ;;  %vm776_vm8 = vmmov 0   ;;  %vm540_vm9 = vcmask 130048  }
  0x2c   :  { %172 = vperm.xlu1 %669, %v55_v6   ;;  %137 = vperm.xlu0 %668, %v55_v6   ;;  %s775_s17 = smov 64   ;;  %s777_s21 = smov [#allocation9]  }
  0x2d   :  { %640 = vmatprep.mubr.msk.f32.mxu0 %vm776_vm8, %v762_v2  ;;  %s622_s22 = sshll.u32 %s777_s21, 4  ;;  %s623_s22 = int_to_ptr.vmem [resolvable:$true] %s622_s22 }
  0x2e   :  { %s728_s23 = scalar_lea.vmem %s623_s22, 128  ;;  %p733_p3 = scmp.lt.s32.totalorder %s623_s22, %s623_s22 }
  0x2f   :  { %p729_p2 = scmp.ne.s32.totalorder %s623_s22, %s728_s23  ;;  %p734_p4 = scmp.lt.s32.totalorder %s728_s23, %s728_s23 }
  0x30   :  { %v835_v9 = vld [vmem:[#allocation2 + $0x8] sm:$0xff]  ;;  %671 = vset.pattern.permute.xlu1 %v763_v10  ;;  %670 = vset.pattern.permute.xlu0 %v763_v10  ;;  %v838_v11 = vld [vmem:[#allocation2 + $0x20] sm:$0xff] }
  0x31   :  { %341 = vst.msk [vmem:[#allocation2 + $0x8] sm:$0xff] %vm50_vm1, %v339_v7  ;;  %194 = vperm.xlu1 %671, %v55_v6   ;;  %190 = vperm.xlu0 %670, %v54_v3   ;;  %342 = vst.msk [vmem:[#allocation2 + $0x20] sm:$0xff] %vm50_vm1, %v340_v8  ;;  %p735_p5 = por %p734_p4, %p733_p3 }
  0x33   :  { %p736_p6 = pnand %p735_p5, %p729_p2 }
  0x35   :  { %672 = vset.pattern.permute.xlu1 %v764_v12  ;;  %673 = vset.pattern.permute.xlu0 %v764_v12 }
  0x36   :  { %212 = vperm.xlu1 %672, %v54_v3   ;;  %216 = vperm.xlu0 %673, %v55_v6  }
  0x38   :  { %v841_v18 = vld [vmem:[#allocation2 + $0x8] sm:$0xff]  ;;  %v844_v23 = vld [vmem:[#allocation2 + $0x20] sm:$0xff] }
  0x3a   :  { %674 = vset.pattern.permute.xlu1 %v765_v13  ;;  %675 = vset.pattern.permute.xlu0 %v766_v14 }
  0x3b   :  { %234 = vperm.xlu1 %674, %v54_v3   ;;  %256 = vperm.xlu0 %675, %v54_v3  }
  0x3f   :  { %238 = vperm.xlu1 %674, %v55_v6   ;;  %678 = vset.pattern.permute.xlu0 %v767_v15 }
  0x40   :  { %89 = vperm.xlu0 %678, %v55_v6  }
  0x43   :  { %676 = vset.pattern.permute.xlu1 %v766_v14 }
  0x44   :  { %260 = vperm.xlu1 %676, %v55_v6   ;;  %680 = vset.pattern.permute.xlu0 %v768_v16 }
  0x45   :  { %117 = vperm.xlu0 %680, %v54_v3  }
  0x48   :  { %677 = vset.pattern.permute.xlu1 %v767_v15 }
  0x49   :  { %84 = vperm.xlu1 %677, %v54_v3   ;;  %683 = vset.pattern.permute.xlu0 %v767_v15 }
  0x4d   :  { %679 = vset.pattern.permute.xlu1 %v769_v17 }
  0x4e   :  { %101 = vperm.xlu1 %679, %v54_v3  }
  0x52   :  { %105 = vperm.xlu1 %679, %v55_v6  }
  0x56   :  { %681 = vset.pattern.permute.xlu1 %v768_v16 }
  0x57   :  { %121 = vperm.xlu1 %681, %v55_v6  }
  0x5b   :  { %682 = vset.pattern.permute.xlu1 %v767_v15 }
  0xa7   :  { %v169_v19 = vpop.permute.xlu1 %168  ;;  %v134_v20 = vpop.permute.xlu0 %133 }
  0xa8   :  { %v372_v21 = vmul.f32 %v841_v18, %v134_v20  ;;  %v371_v22 = vmul.f32 0.0, %v134_v20  ;;  %v397_v28 = vmul.f32 %v841_v18, %v169_v19  ;;  %v141_v46 = vmul.f32 %v134_v20, %v835_v9 }
  0xa9   :  { %v175_v47 = vmul.f32 %v169_v19, %v835_v9 }
  0xaa   :  { %381 = vrot.lane.b32.xlu0 %v372_v21, %s770_s1  ;;  %379 = vrot.lane.b32.xlu1 %v371_v22, %s770_s1 }
  0xab   :  { %v138_v24 = vpop.permute.xlu0 %137  ;;  %v173_v25 = vpop.permute.xlu1 %172 }
  0xac   :  { %v374_v26 = vmul.f32 %v844_v23, %v138_v24  ;;  %v373_v27 = vmul.f32 0.0, %v138_v24  ;;  %v398_v29 = vmul.f32 %v844_v23, %v173_v25  ;;  %v143_v48 = vmul.f32 %v138_v24, %v838_v11 }
  0xad   :  { %v176_v49 = vmul.f32 %v173_v25, %v838_v11 }
  0xae   :  { %385 = vrot.lane.b32.xlu0 %v374_v26, %s770_s1  ;;  %383 = vrot.lane.b32.xlu1 %v373_v27, %s770_s1 }
  0xb0   :  { %v195_v30 = vpop.permute.xlu1 %194  ;;  %v191_v31 = vpop.permute.xlu0 %190 }
  0xb1   :  { %v411_v32 = vmul.f32 %v841_v18, %v191_v31  ;;  %v412_v33 = vmul.f32 %v844_v23, %v195_v30  ;;  %v197_v50 = vmul.f32 %v191_v31, %v835_v9  ;;  %v198_v51 = vmul.f32 %v195_v30, %v838_v11 }
  0xb2   :  { %403 = vrot.lane.b32.xlu0 %v398_v29, %s770_s1  ;;  %401 = vrot.lane.b32.xlu1 %v397_v28, %s770_s1 }
  0xb5   :  { %v213_v34 = vpop.permute.xlu1 %212  ;;  %v217_v35 = vpop.permute.xlu0 %216 }
  0xb6   :  { %v425_v36 = vmul.f32 %v841_v18, %v213_v34  ;;  %417 = vrot.lane.b32.xlu0 %v412_v33, %s770_s1  ;;  %415 = vrot.lane.b32.xlu1 %v411_v32, %s770_s1  ;;  %v426_v37 = vmul.f32 %v844_v23, %v217_v35  ;;  %v219_v52 = vmul.f32 %v213_v34, %v835_v9 }
  0xb7   :  { %v220_v53 = vmul.f32 %v217_v35, %v838_v11 }
  0xba   :  { %v235_v38 = vpop.permute.xlu1 %234  ;;  %431 = vrot.lane.b32.xlu0 %v426_v37, %s771_s14  ;;  %429 = vrot.lane.b32.xlu1 %v425_v36, %s771_s14  ;;  %v257_v40 = vpop.permute.xlu0 %256 }
  0xbb   :  { %v439_v39 = vmul.f32 %v841_v18, %v235_v38  ;;  %v453_v42 = vmul.f32 %v841_v18, %v257_v40  ;;  %v241_v54 = vmul.f32 %v235_v38, %v835_v9  ;;  %v263_v56 = vmul.f32 %v257_v40, %v835_v9 }
  0xbe   :  { %v239_v41 = vpop.permute.xlu1 %238  ;;  %443 = vrot.lane.b32.xlu1 %v439_v39, %s771_s14 }
  0xbf   :  { %v440_v43 = vmul.f32 %v844_v23, %v239_v41  ;;  %v242_v55 = vmul.f32 %v239_v41, %v838_v11  ;;  %v901_v60 = vpop.permute.xlu0 %89 }
  0xc0   :  { %v350_v14 = vmul.f32 %v844_v23, %v901_v60 }
  0xc1   :  { %445 = vrot.lane.b32.xlu0 %v440_v43, %s771_s14 }
  0xc2   :  { %457 = vrot.lane.b32.xlu1 %v453_v42, %s771_s14 }
  0xc3   :  { %v261_v44 = vpop.permute.xlu1 %260 }
  0xc4   :  { %v454_v45 = vmul.f32 %v844_v23, %v261_v44  ;;  %v264_v57 = vmul.f32 %v261_v44, %v838_v11  ;;  %v907_v63 = vpop.permute.xlu0 %117 }
  0xc5   :  { %v929_v33 = vmul.f32 0.0, %v907_v63  ;;  %v364_v41 = vmul.f32 %v841_v18, %v907_v63 }
  0xc6   :  { %459 = vrot.lane.b32.xlu0 %v454_v45, %s771_s14  ;;  %148 = vrot.lane.b32.xlu1 %v371_v22, %s770_s1 }
  0xc8   :  { %v897_v58 = vpop.permute.xlu1 %84 }
  0xc9   :  { %v348_v10 = vmul.f32 %v841_v18, %v897_v58  ;;  %v936_v40 = vmul.f32 0.0, %v897_v58 }
  0xca   :  { %150 = vrot.lane.b32.xlu0 %v141_v46, %s770_s1  ;;  %152 = vrot.lane.b32.xlu1 %v373_v27, %s770_s1 }
  0xcd   :  { %v899_v59 = vpop.permute.xlu1 %101 }
  0xce   :  { %154 = vrot.lane.b32.xlu0 %v143_v48, %s770_s1  ;;  %179 = vrot.lane.b32.xlu1 %v175_v47, %s770_s1  ;;  %v914_v15 = vmul.f32 0.0, %v899_v59  ;;  %v356_v24 = vmul.f32 %v841_v18, %v899_v59 }
  0xd1   :  { %v903_v61 = vpop.permute.xlu1 %105 }
  0xd2   :  { %181 = vrot.lane.b32.xlu0 %v176_v49, %s770_s1  ;;  %201 = vrot.lane.b32.xlu1 %v197_v50, %s770_s1  ;;  %v919_v21 = vmul.f32 0.0, %v903_v61  ;;  %v358_v32 = vmul.f32 %v844_v23, %v903_v61  ;;  %v349_v49 = vmul.f32 0.0, %v901_v60 }
  0xd6   :  { %203 = vrot.lane.b32.xlu0 %v198_v51, %s770_s1  ;;  %223 = vrot.lane.b32.xlu1 %v219_v52, %s771_s14  ;;  %v905_v62 = vpop.permute.xlu1 %121 }
  0xd7   :  { %v366_v50 = vmul.f32 %v844_v23, %v905_v62 }
  0xda   :  { %225 = vrot.lane.b32.xlu0 %v220_v53, %s771_s14  ;;  %245 = vrot.lane.b32.xlu1 %v241_v54, %s771_s14 }
  0xde   :  { %247 = vrot.lane.b32.xlu0 %v242_v55, %s771_s14  ;;  %267 = vrot.lane.b32.xlu1 %v263_v56, %s771_s14  ;;  %v365_v56 = vmul.f32 0.0, %v905_v62 }
  0xe2   :  { %269 = vrot.lane.b32.xlu0 %v264_v57, %s771_s14 }
 0x11c   :  { %v382_v0 = vpop.permute.xlu0 %381  ;;  %v380_v1 = vpop.permute.xlu1 %379 }
 0x11d   :  { %v394_v12 = vadd.f32 %v382_v0, %v348_v10  ;;  %v387_v37 = vsel %vm156_vm2, %v380_v1, %v382_v0 }
 0x11e   :  { %v393_v44 = vadd.f32 %v387_v37, %v936_v40 }
 0x120   :  { %v386_v3 = vpop.permute.xlu0 %385  ;;  %v384_v4 = vpop.permute.xlu1 %383 }
 0x121   :  { %v396_v19 = vadd.f32 %v386_v3, %v350_v14  ;;  %v388_v46 = vsel %vm156_vm2, %v384_v4, %v386_v3 }
 0x122   :  { %v395_v52 = vadd.f32 %v388_v46, %v349_v49 }
 0x124   :  { %v404_v5 = vpop.permute.xlu0 %403  ;;  %v402_v6 = vpop.permute.xlu1 %401 }
 0x125   :  { %v407_v20 = vadd.f32 %v402_v6, %v914_v15  ;;  %v409_v27 = vadd.f32 %v404_v5, %v919_v21  ;;  %v408_v28 = vadd.f32 %v402_v6, %v356_v24  ;;  %v410_v35 = vadd.f32 %v404_v5, %v358_v32 }
 0x126   :  { %v93_v5 = vmul.f32 %v897_v58, %v835_v9 }
 0x128   :  { %v418_v7 = vpop.permute.xlu0 %417  ;;  %v416_v8 = vpop.permute.xlu1 %415 }
 0x129   :  { %v421_v36 = vadd.f32 %v416_v8, %v929_v33  ;;  %v422_v45 = vadd.f32 %v416_v8, %v364_v41  ;;  %v424_v53 = vadd.f32 %v418_v7, %v366_v50  ;;  %v423_v1 = vadd.f32 %v418_v7, %v365_v56 }
 0x12c   :  { %v430_v13 = vpop.permute.xlu1 %429  ;;  %v432_v17 = vpop.permute.xlu0 %431 }
 0x12d   :  { %v436_v16 = vadd.f32 %v430_v13, %v394_v12  ;;  %v438_v25 = vadd.f32 %v432_v17, %v396_v19  ;;  %v435_v18 = vadd.f32 %v430_v13, %v393_v44  ;;  %v437_v57 = vadd.f32 %v432_v17, %v395_v52 }
 0x12e   :  { %v95_v12 = vmul.f32 %v901_v60, %v838_v11  ;;  %v109_v19 = vmul.f32 %v899_v59, %v835_v9 }
 0x12f   :  { %473 = vrot.lane.b32.xlu0 %v436_v16, %s772_s15 }
 0x130   :  { %v444_v22 = vpop.permute.xlu1 %443 }
 0x131   :  { %v449_v26 = vadd.f32 %v444_v22, %v407_v20  ;;  %v450_v34 = vadd.f32 %v444_v22, %v408_v28 }
 0x133   :  { %v446_v29 = vpop.permute.xlu0 %445  ;;  %477 = vrot.lane.b32.xlu0 %v438_v25, %s772_s15  ;;  %489 = vrot.lane.b32.xlu1 %v449_v26, %s758_s26 }
 0x134   :  { %v458_v30 = vpop.permute.xlu1 %457  ;;  %v451_v31 = vadd.f32 %v446_v29, %v409_v27  ;;  %v452_v43 = vadd.f32 %v446_v29, %v410_v35 }
 0x135   :  { %v463_v42 = vadd.f32 %v458_v30, %v421_v36  ;;  %v464_v51 = vadd.f32 %v458_v30, %v422_v45 }
 0x137   :  { %491 = vrot.lane.b32.xlu0 %v450_v34, %s758_s26  ;;  %493 = vrot.lane.b32.xlu1 %v451_v31, %s758_s26  ;;  %v127_v34 = vmul.f32 %v905_v62, %v838_v11  ;;  %v58_v62 = vlaneseq }
 0x138   :  { %v460_v38 = vpop.permute.xlu0 %459  ;;  %v149_v39 = vpop.permute.xlu1 %148 }
 0x139   :  { %v466_v0 = vadd.f32 %v460_v38, %v424_v53  ;;  %v465_v4 = vadd.f32 %v460_v38, %v423_v1  ;;  %v59_v44 = vand.u32 127, %v58_v62 }
 0x13b   :  { %495 = vrot.lane.b32.xlu0 %v452_v43, %s758_s26  ;;  %507 = vrot.lane.b32.xlu1 %v463_v42, %s773_s16 }
 0x13c   :  { %v151_v47 = vpop.permute.xlu0 %150  ;;  %v153_v48 = vpop.permute.xlu1 %152 }
 0x13d   :  { %v164_v6 = vadd.f32 %v151_v47, %v93_v5  ;;  %v157_v59 = vsel %vm156_vm2, %v149_v39, %v151_v47  ;;  %v64_v47 = vand.u32 7, %v59_v44 }
 0x13e   :  { %v163_v32 = vadd.f32 %v936_v40, %v157_v59 }
 0x13f   :  { %509 = vrot.lane.b32.xlu0 %v464_v51, %s773_s16  ;;  %471 = vrot.lane.b32.xlu1 %v435_v18, %s772_s15  ;;  %vm983_vm6 = vcmp.ge.s32.totalorder %v64_v47, 1  ;;  %vm987_vm7 = vcmp.lt.s32.totalorder %v64_v47, 7 }
 0x140   :  { %v155_v54 = vpop.permute.xlu0 %154  ;;  %v180_v55 = vpop.permute.xlu1 %179 }
 0x141   :  { %v166_v7 = vadd.f32 %v155_v54, %v95_v12  ;;  %v185_v14 = vadd.f32 %v914_v15, %v180_v55  ;;  %v186_v22 = vadd.f32 %v180_v55, %v109_v19  ;;  %v111_v15 = vmul.f32 %v903_v61, %v838_v11 }
 0x142   :  { %v774_v55 = vmov 0.0|0.0  }
 0x143   :  { %513 = vrot.lane.b32.xlu0 %v466_v0, %s773_s16  ;;  %475 = vrot.lane.b32.xlu1 %v437_v57, %s772_s15 }
 0x144   :  { %v182_v23 = vpop.permute.xlu0 %181  ;;  %v202_v3 = vpop.permute.xlu1 %201  ;;  %643 = vmatprep.subr.bf16.mxu0 %v774_v55 }
 0x145   :  { %v187_v24 = vadd.f32 %v919_v21, %v182_v23  ;;  %v188_v28 = vadd.f32 %v182_v23, %v111_v15  ;;  %v207_v29 = vadd.f32 %v929_v33, %v202_v3  ;;  %v125_v21 = vmul.f32 %v907_v63, %v835_v9 }
 0x146   :  { %v158_v33 = vsel %vm156_vm2, %v153_v48, %v155_v54 }
 0x147   :  { %511 = vrot.lane.b32.xlu1 %v465_v4, %s773_s16  ;;  %v208_v61 = vadd.f32 %v202_v3, %v125_v21  ;;  %v165_v38 = vadd.f32 %v349_v49, %v158_v33 }
 0x148   :  { %v204_v8 = vpop.permute.xlu0 %203  ;;  %v224_v10 = vpop.permute.xlu1 %223 }
 0x149   :  { %v230_v13 = vadd.f32 %v224_v10, %v164_v6  ;;  %v229_v35 = vadd.f32 %v224_v10, %v163_v32  ;;  %v210_v39 = vadd.f32 %v204_v8, %v127_v34  ;;  %v209_v40 = vadd.f32 %v365_v56, %v204_v8 }
 0x14b   :  { %283 = vrot.lane.b32.xlu0 %v230_v13, %s772_s15 }
 0x14c   :  { %v226_v16 = vpop.permute.xlu0 %225  ;;  %v246_v17 = vpop.permute.xlu1 %245 }
 0x14d   :  { %v232_v58 = vadd.f32 %v226_v16, %v166_v7  ;;  %v251_v20 = vadd.f32 %v246_v17, %v185_v14  ;;  %v252_v25 = vadd.f32 %v246_v17, %v186_v22  ;;  %v231_v9 = vadd.f32 %v226_v16, %v165_v38  ;;  %v57_v17 = vld [vmem:[%s1045_s3] sm:$0xff] }
 0x14f   :  { %287 = vrot.lane.b32.xlu0 %v232_v58, %s772_s15  ;;  %300 = vrot.lane.b32.xlu1 %v251_v20, %s758_s26 }
 0x150   :  { %v248_v60 = vpop.permute.xlu0 %247  ;;  %v268_v27 = vpop.permute.xlu1 %267 }
 0x151   :  { %v253_v26 = vadd.f32 %v248_v60, %v187_v24  ;;  %v273_v30 = vadd.f32 %v268_v27, %v207_v29  ;;  %v254_v31 = vadd.f32 %v248_v60, %v188_v28  ;;  %v274_v36 = vadd.f32 %v268_v27, %v208_v61 }
 0x153   :  { %302 = vrot.lane.b32.xlu0 %v252_v25, %s758_s26  ;;  %304 = vrot.lane.b32.xlu1 %v253_v26, %s758_s26 }
 0x154   :  { %v270_v37 = vpop.permute.xlu0 %269 }
 0x155   :  { %v276_v63 = vadd.f32 %v270_v37, %v210_v39  ;;  %v275_v41 = vadd.f32 %v270_v37, %v209_v40 }
 0x157   :  { %306 = vrot.lane.b32.xlu0 %v254_v31, %s758_s26  ;;  %319 = vrot.lane.b32.xlu1 %v273_v30, %s773_s16 }
 0x15b   :  { %321 = vrot.lane.b32.xlu0 %v274_v36, %s773_s16  ;;  %281 = vrot.lane.b32.xlu1 %v229_v35, %s772_s15 }
 0x15f   :  { %325 = vrot.lane.b32.xlu0 %v276_v63, %s773_s16  ;;  %285 = vrot.lane.b32.xlu1 %v231_v9, %s772_s15 }
 0x163   :  { %323 = vrot.lane.b32.xlu1 %v275_v41, %s773_s16 }
 0x1a1   :  { %v474_v11 = vpop.permute.xlu0 %473 }
 0x1a5   :  { %v478_v42 = vpop.permute.xlu0 %477  ;;  %v490_v43 = vpop.permute.xlu1 %489 }
 0x1a9   :  { %v492_v45 = vpop.permute.xlu0 %491  ;;  %v494_v46 = vpop.permute.xlu1 %493 }
 0x1aa   :  { %v497_v56 = vsel %vm308_vm5, %v490_v43, %v492_v45 }
 0x1ad   :  { %v496_v48 = vpop.permute.xlu0 %495  ;;  %v508_v49 = vpop.permute.xlu1 %507 }
 0x1ae   :  { %v498_v6 = vsel %vm308_vm5, %v494_v46, %v496_v48 }
 0x1b1   :  { %v510_v18 = vpop.permute.xlu0 %509  ;;  %v472_v51 = vpop.permute.xlu1 %471 }
 0x1b2   :  { %v515_v53 = vsel %vm327_vm3, %v508_v49, %v510_v18  ;;  %v479_v54 = vsel %vm289_vm4, %v472_v51, %v474_v11  ;;  %v56_v11 = vld [vmem:[%s1044_s2] sm:$0xff] }
 0x1b3   :  { %v483_v57 = vsel %vm983_vm6, %v479_v54, 0.0  ;;  %v519_v1 = vsel %vm987_vm7, %v515_v53, 0.0 }
 0x1b4   :  { %v501_v0 = vadd.f32 %v497_v56, %v483_v57 }
 0x1b5   :  { %v476_v23 = vpop.permute.xlu1 %475  ;;  %v514_v8 = vpop.permute.xlu0 %513 }
 0x1b6   :  { %v480_v3 = vsel %vm289_vm4, %v476_v23, %v478_v42  ;;  %v521_v4 = vadd.f32 %v519_v1, %v501_v0 }
 0x1b7   :  { %v484_v5 = vsel %vm983_vm6, %v480_v3, 0.0 }
 0x1b8   :  { %525 = vrot.lane.b32.xlu1 %v521_v4, %s775_s17  ;;  %v502_v12 = vadd.f32 %v498_v6, %v484_v5 }
 0x1b9   :  { %v512_v10 = vpop.permute.xlu1 %511 }
 0x1ba   :  { %v516_v13 = vsel %vm327_vm3, %v512_v10, %v514_v8 }
 0x1bb   :  { %v520_v7 = vsel %vm987_vm7, %v516_v13, 0.0 }
 0x1bc   :  { %v522_v14 = vadd.f32 %v520_v7, %v502_v12  ;;  %537 = vperm.xlu1 %682, %v57_v17  }
 0x1bd   :  { %v284_v16 = vpop.permute.xlu0 %283 }
 0x1be   :  { %527 = vrot.lane.b32.xlu0 %v522_v14, %s775_s17 }
 0x1c1   :  { %v288_v19 = vpop.permute.xlu0 %287  ;;  %v301_v58 = vpop.permute.xlu1 %300 }
 0x1c5   :  { %v303_v20 = vpop.permute.xlu0 %302  ;;  %v305_v22 = vpop.permute.xlu1 %304 }
 0x1c6   :  { %v309_v2 = vsel %vm308_vm5, %v301_v58, %v303_v20 }
 0x1c9   :  { %v307_v24 = vpop.permute.xlu0 %306  ;;  %v320_v60 = vpop.permute.xlu1 %319 }
 0x1ca   :  { %v310_v61 = vsel %vm308_vm5, %v305_v22, %v307_v24 }
 0x1cd   :  { %v322_v15 = vpop.permute.xlu0 %321  ;;  %v282_v25 = vpop.permute.xlu1 %281 }
 0x1ce   :  { %v328_v26 = vsel %vm327_vm3, %v320_v60, %v322_v15  ;;  %v290_v27 = vsel %vm289_vm4, %v282_v25, %v284_v16 }
 0x1cf   :  { %v294_v28 = vsel %vm983_vm6, %v290_v27, 0.0  ;;  %v332_v59 = vsel %vm987_vm7, %v328_v26, 0.0 }
 0x1d0   :  { %v313_v29 = vadd.f32 %v309_v2, %v294_v28 }
 0x1d1   :  { %v286_v21 = vpop.permute.xlu1 %285  ;;  %v326_v33 = vpop.permute.xlu0 %325 }
 0x1d2   :  { %v334_v30 = vadd.f32 %v332_v59, %v313_v29  ;;  %v291_v31 = vsel %vm289_vm4, %v286_v21, %v288_v19 }
 0x1d3   :  { %v295_v32 = vsel %vm983_vm6, %v291_v31, 0.0 }
 0x1d4   :  { %336 = vst.msk [vmem:[#allocation3] sm:$0xff] %vm50_vm1, %v334_v30  ;;  %v314_v35 = vadd.f32 %v310_v61, %v295_v32 }
 0x1d5   :  { %v324_v34 = vpop.permute.xlu1 %323 }
 0x1d6   :  { %v329_v36 = vsel %vm327_vm3, %v324_v34, %v326_v33 }
 0x1d7   :  { %v333_v37 = vsel %vm987_vm7, %v329_v36, 0.0 }
 0x1d8   :  { %v335_v38 = vadd.f32 %v333_v37, %v314_v35 }
 0x1da   :  { %337 = vst.msk [vmem:[#allocation3 + $0x8] sm:$0xff] %vm50_vm1, %v335_v38 }
 0x22a   :  { %v526_v39 = vpop.permute.xlu1 %525 }
 0x22b   :  { %531 = vst.msk [vmem:[#allocation3] sm:$0xff] %vm48_vm0, %v526_v39 }
 0x230   :  { %v528_v9 = vpop.permute.xlu0 %527 }
 0x231   :  { %532 = vst.msk [vmem:[#allocation3 + $0x8] sm:$0xff] %vm48_vm0, %v528_v9 }
 0x232   :  { %v533_v63 = vld [vmem:[#allocation3] sm:$0xff] }
 0x238   :  { %v534_v40 = vld [vmem:[#allocation3 + $0x8] sm:$0xff] }
 0x239   :  { %v644_v41 = vpack.c.bf16 %v534_v40, %v533_v63 }
 0x23b   :  { %645 = vmatpush3.bf16.msra.mxu0 %v644_v41  ;;  %v538_v62 = vpop.permute.xlu1 %537 }
 0x23e   :  { %641 = vmatmul.mubr.msk.f32.vlgmr.msra.gmra.mrb[0].mxu0 %vm540_vm9, %v56_v11 }
 0x311   :  { %v610_v42 = vpop.f32.mrb[0].mxu0 }
 0x312   :  { %v611_v43 = vadd.f32 %v610_v42, %v538_v62  ;;  %v642_v44 = vpop.f32.mrb[1].mxu0 }
 0x314   :  { %v614_v45 = vmax.f32 %v611_v43, 0.0 }
 0x316   :  { %615 = vst [vmem:[#allocation9] sm:$0xff] %v614_v45 }
 0x317   :  { %739 = shalt.err (!%p736_p6)
}
 0x318   :  { %s740_s25 = scalar_lea.hbm %s1046_s4, 128 }
 0x319   :  { %p741_p7 = scmp.ne.s32.totalorder %s1046_s4, %s740_s25  ;;  %p744_p8 = scmp.lt.u32.totalorder %s740_s25, %s1046_s4 }
 0x31b   :  { %p746_p9 = pnand %p744_p8, %p741_p7 }
 0x31d   :  { %749 = shalt.err (!%p746_p9)
}
 0x31e   :  { %625 = dma.vmem_to_hbm [thread:$0]  %s623_s22, 128, %s1046_s4, [#allocation6]  }
 0x31f   :  { %754 = dma.done.wait [#allocation6], 128  }
 0x320   :  { %755 = vsyncadd [#allocation6], 4294967168 }
 0x321   :  { %629 = vsyncpa [#allocation5], 1 }
 0x322   :  { %630 = vsyncpa [#allocation8], 1 }
 0x323   :  { %631 = vsyncpa [#allocation6], 1 }

</bundles_post_ra>
